<compile_context>
chip_gen: v5e
topology: v5e:2x2
jax: 0.10.0
libtpu: 0.0.40
codegen_flags: <defaults>
</compile_context>

<pallas_src>
import jax
import jax.numpy as jnp
from jax.experimental import pallas as pl
from jax.experimental.pallas import tpu as pltpu


def _round_up(v: int, m: int) -> int:
    return (v + m - 1) // m * m


def _cdiv(a: int, b: int) -> int:
    return (a + b - 1) // b


def _choose_bm(b8: int, k: int, n: int,
               vmem_budget_bytes: int = 12 * 1024 * 1024) -> int:
    """Batch-tile rows: multiple of 8 sublanes, sized from a VMEM budget that
    fits v5e/v6e/v7x scoped defaults, and split so a large batch gives >= 2
    grid steps (v7x has 2 TensorCores; the batch axis is marked "parallel")."""
    # Per grid step: double-buffered f32 x tile (bm, K) + out tile (bm, N).
    per_row_bytes = 2 * 4 * (k + n)
    bm_cap = max(8, (vmem_budget_bytes // per_row_bytes) // 8 * 8)
    bm_cap = min(bm_cap, 4096)  # diminishing returns past a few K rows/step
    # At least 2 grid steps when there is enough batch to split.
    bm = min(bm_cap, _round_up(_cdiv(b8, 2), 8))
    return max(8, bm)


def _diag_gaussian_mean_kernel(x_ref, w_ref, b_ref, mean_ref):
    # mean = x @ W^T + b  (single MXU contraction per batch tile, f32 accum)
    mean = jnp.dot(x_ref[...], w_ref[...], preferred_element_type=jnp.float32)
    mean_ref[...] = (mean + b_ref[...]).astype(mean_ref.dtype)


@jax.jit
def diag_gaussian_forward(x, w_t, b, logstd):
    """Returns (mean, scale) of the diagonal Gaussian policy head.

    x:      (B, num_inputs)               float32
    w_t:    (num_inputs, num_outputs)     float32  -- transposed Linear weight
    b:      (1, num_outputs)              float32  -- Linear bias (zeros)
    logstd: (1, num_outputs)              float32  -- log(std) AddBias param

    scale is returned with shape (1, num_outputs); Normal(mean, scale)
    broadcasts it lazily, so no (B, N) scale tensor hits HBM.
    """
    B, K = x.shape
    N = w_t.shape[1]

    # Sublane-align the batch only. No K/N lane padding: block last dims are
    # the full array dims (allowed), Mosaic handles vreg-internal padding.
    B8 = _round_up(B, 8)
    bm = _choose_bm(B8, K, N)
    x_p = jnp.pad(x, ((0, B8 - B), (0, 0))) if B8 != B else x

    grid = (_cdiv(B8, bm),)

    mean_p = pl.pallas_call(
        _diag_gaussian_mean_kernel,
        out_shape=jax.ShapeDtypeStruct((B8, N), jnp.float32),
        grid=grid,
        in_specs=[
            pl.BlockSpec((bm, K), lambda i: (i, 0)),   # x: streams over batch
            pl.BlockSpec((K, N), lambda i: (0, 0)),    # W^T: VMEM-resident
            pl.BlockSpec((1, N), lambda i: (0, 0)),    # bias: VMEM-resident
        ],
        out_specs=pl.BlockSpec((bm, N), lambda i: (i, 0)),
        compiler_params=pltpu.CompilerParams(
            dimension_semantics=("parallel",),   # shard batch across TCs (v7x)
        ),
        cost_estimate=pl.CostEstimate(
            flops=2 * B8 * K * N,
            transcendentals=0,
            bytes_accessed=4 * (B8 * K + K * N + B8 * N + N),
        ),
    )(x_p, w_t, b)

    mean = mean_p[:B] if B8 != B else mean_p

    # scale = exp(logstd) is batch-independent: one tiny (1, N) exp, no
    # (B, N) broadcast/writeback. Matches Normal(action_mean, logstd.exp()).
    scale = jnp.exp(logstd)
    return mean, scale


def _orthogonal_init(key, rows, cols, gain=1.0, dtype=jnp.float32):
    """Deterministic orthogonal init (QR of square Gaussian).

    Matches nn.init.orthogonal_ semantics (orthonormal rows), though not
    bit-identical to PyTorch's flatten/transpose scheme — fine for the demo.
    """
    n = max(rows, cols)
    a = jax.random.normal(key, (n, n), dtype=jnp.float32)
    q, r = jnp.linalg.qr(a)
    q = q * jnp.sign(jnp.diag(r))[None, :]
    return (gain * q[:rows, :cols]).astype(dtype)


if __name__ == "__main__":
    num_inputs = 32
    num_outputs = 8
    batch = 4
    std = 0.5

    key = jax.random.PRNGKey(0)
    k_w, k_x = jax.random.split(key)

    # Parameters (deterministic, synthetic — mirrors __init__ shapes):
    #   fc_mean.weight: (num_outputs, num_inputs), orthogonal init
    #   fc_mean.bias:   (num_outputs,), zeros
    #   logstd bias:    (1, num_outputs), value log(std)
    w = _orthogonal_init(k_w, num_outputs, num_inputs)        # torch layout (N, K)
    w_t = jnp.transpose(w)                                    # (K, N) for kernel
    b = jnp.zeros((1, num_outputs), dtype=jnp.float32)
    logstd = jnp.log(jnp.ones((1, num_outputs), dtype=jnp.float32) * std)

    x = jax.random.normal(k_x, (batch, num_inputs), dtype=jnp.float32)

    mean, scale = diag_gaussian_forward(x, w_t, b, logstd)
    jax.block_until_ready((mean, scale))

    # Reference check in plain JAX.
    ref_mean = x @ w_t + b
    ref_scale = jnp.exp(logstd)
    assert mean.shape == (batch, num_outputs)
    assert scale.shape == (1, num_outputs)
    assert jnp.allclose(mean, ref_mean, atol=1e-5, rtol=1e-5)
    assert jnp.allclose(scale, ref_scale, atol=1e-6, rtol=1e-6)
    # Normal(mean, scale) broadcasts scale to (batch, num_outputs) lazily.

    print("KERNEL_OK")
</pallas_src>

<mosaic_0001>
module attributes {stable_mosaic.version = 11 : i64} {
  func.func @_diag_gaussian_mean_kernel(%arg0: i32, %arg1: memref<8x32xf32, #tpu.memory_space<vmem>>, %arg2: memref<32x8xf32, #tpu.memory_space<vmem>>, %arg3: memref<1x8xf32, #tpu.memory_space<vmem>>, %arg4: memref<8x8xf32, #tpu.memory_space<vmem>>) attributes {dimension_semantics = [#tpu.dimension_semantics<parallel>], iteration_bounds = array<i64: 1>, scalar_prefetch = 0 : i64, scratch_operands = 0 : i64, tpu.core_type = #tpu.core_type<tc>, window_params = [{transform_indices = @transform_0, window_bounds = array<i64: 8, 32>}, {pipeline_mode = #tpu.pipeline_mode<synchronous>, transform_indices = @transform_1, window_bounds = array<i64: 32, 8>}, {pipeline_mode = #tpu.pipeline_mode<synchronous>, transform_indices = @transform_2, window_bounds = array<i64: 1, 8>}, {transform_indices = @transform_3, window_bounds = array<i64: 8, 8>}]} {
    %c0 = arith.constant 0 : index
    %c0_0 = arith.constant 0 : index
    %0 = vector.load %arg1[%c0, %c0_0] : memref<8x32xf32, #tpu.memory_space<vmem>>, vector<8x32xf32>
    %c0_1 = arith.constant 0 : index
    %c0_2 = arith.constant 0 : index
    %1 = vector.load %arg2[%c0_1, %c0_2] : memref<32x8xf32, #tpu.memory_space<vmem>>, vector<32x8xf32>
    %cst = arith.constant dense<0.000000e+00> : vector<8x8xf32>
    %2 = tpu.matmul %0, %1, %cst {dimension_numbers = #tpu.dot_dimension_numbers<[1], [0], [0], [1], [0, 0, 1, 1], [], []>} : vector<8x32xf32>, vector<32x8xf32>, vector<8x8xf32> -> vector<8x8xf32>
    %c0_3 = arith.constant 0 : index
    %c0_4 = arith.constant 0 : index
    %3 = vector.load %arg3[%c0_3, %c0_4] : memref<1x8xf32, #tpu.memory_space<vmem>>, vector<1x8xf32>
    %4 = vector.broadcast %3 : vector<1x8xf32> to vector<8x8xf32>
    %5 = arith.addf %2, %4 : vector<8x8xf32>
    %c0_5 = arith.constant 0 : index
    %c0_6 = arith.constant 0 : index
    %6 = vector.load %arg4[%c0_5, %c0_6] : memref<8x8xf32, #tpu.memory_space<vmem>>, vector<8x8xf32>
    tpu.vector_store %arg4[%c0_5, %c0_6], %5 {strides = array<i32>} : memref<8x8xf32, #tpu.memory_space<vmem>>, vector<8x8xf32>,
    return
  }
  func.func @transform_0(%arg0: i32) -> (i32, i32) {
    %c0_i32 = arith.constant 0 : i32
    %c0_i32_0 = arith.constant 0 : i32
    return %arg0, %c0_i32 : i32, i32
  }
  func.func @transform_1(%arg0: i32) -> (i32, i32) {
    %c0_i32 = arith.constant 0 : i32
    %c0_i32_0 = arith.constant 0 : i32
    %c0_i32_1 = arith.constant 0 : i32
    return %c0_i32, %c0_i32_0 : i32, i32
  }
  func.func @transform_2(%arg0: i32) -> (i32, i32) {
    %c0_i32 = arith.constant 0 : i32
    %c0_i32_0 = arith.constant 0 : i32
    %c0_i32_1 = arith.constant 0 : i32
    return %c0_i32, %c0_i32_0 : i32, i32
  }
  func.func @transform_3(%arg0: i32) -> (i32, i32) {
    %c0_i32 = arith.constant 0 : i32
    %c0_i32_0 = arith.constant 0 : i32
    return %arg0, %c0_i32 : i32, i32
  }
}

</mosaic_0001>

<bundles_post_ra>
// kernel: diag_gaussian_forward.1
= control target key start
LH: loop header
LB: loop body
LE: loop exit
PB: predicated region body
PF: predicated region fallthrough
CT: control target
= control target key end

     0   :  { %vm23_vm0 = vcmask 261120   ;;  %vm47_vm1 = vcmask 64512   ;;  %s96_s1 = inlined_call_operand.vmem [shape: f32[32,8], index: 1, kind: input, shape index: {}]   ;;  %s97_s2 = inlined_call_operand.vmem [shape: f32[1,8], index: 2, kind: input, shape index: {}]   ;;  %s98_s0 = inlined_call_operand.vmem [shape: f32[8,32], index: 0, kind: input, shape index: {}]   ;;  %s99_s3 = inlined_call_operand.vmem [shape: f32[8,8], index: 3, kind: output, shape index: {}]  }
   0x1   :  { %v18_v0 = vld [vmem:[%s96_s1 + $0x18] sm:$0xff]  ;;  %v17_v1 = vld [vmem:[%s96_s1 + $0x10] sm:$0xff]  ;;  %v16_v2 = vld [vmem:[%s96_s1 + $0x8] sm:$0xff] }
   0x2   :  { %39 = vmatpush.msra.mxu0 %v18_v0  ;;  %v15_v3 = vld [vmem:[%s96_s1] sm:$0xff] }
   0x3   :  { %v14_v4 = vld [vmem:[%s98_s0] sm:$0xff] }
   0x4   :  { %40 = vmatpush.msra.mxu0 %v17_v1  ;;  %v54_v5 = vld [vmem:[%s97_s2] ss:$0 sm:$0xff] }
   0x6   :  { %41 = vmatpush.msra.mxu0 %v16_v2 }
   0x8   :  { %42 = vmatpush.msra.mxu0 %v15_v3 }
   0x9   :  { %53 = vmatmul.msk.f32.vlgmr.msra.gmra.mxu0 %vm23_vm0, %v14_v4 }
  0x86   :  { %v44_v6 = vpop.f32.mrf.mxu0 }
  0x87   :  { %v45_v7 = vadd.f32 %v54_v5, %v44_v6 }
  0x89   :  { %48 = vst.msk [vmem:[%s99_s3] sm:$0xff] %vm47_vm1, %v45_v7 }

</bundles_post_ra>
